<compile_context>
chip_gen: v6e
topology: v6e:2x2x1
jax: 0.10.0
libtpu: 0.0.40
codegen_flags: <defaults>
</compile_context>

<pallas_src>
import jax
import jax.numpy as jnp
from jax import lax
from jax.experimental import pallas as pl
from jax.experimental.pallas import tpu as pltpu

LN_EPS = 1e-5          # torch.nn.LayerNorm default
ROW_TARGET = 512       # target MXU rows (Bb * T) per grid step


def _conv_relu_ln(h, w, bias, gamma, beta, t_in_seq, seq_len, k_size):
    """Fused Conv1d('same', odd K) + bias + ReLU + LayerNorm over channels."""
    rows = h.shape[0]
    pad = (k_size - 1) // 2

    # Shifted copies of h via XLU rolls; wrapped / cross-sequence rows zeroed.
    taps = []
    for k in range(k_size):
        off = k - pad
        if off == 0:
            taps.append(h)
        else:
            rolled = pltpu.roll(h, shift=(-off) % rows, axis=0)
            valid = jnp.logical_and(t_in_seq + off >= 0, t_in_seq + off < seq_len)
            taps.append(jnp.where(valid, rolled, 0.0))
    lhs = taps[0] if k_size == 1 else jnp.concatenate(taps, axis=1)

    # Single fused im2col matmul: bf16 operands, f32 accumulation on the MXU.
    acc = jnp.dot(lhs.astype(jnp.bfloat16), w,
                  preferred_element_type=jnp.float32)
    acc = jnp.maximum(acc + bias, 0.0)                    # bias + ReLU (f32)

    mean = jnp.mean(acc, axis=-1, keepdims=True)          # LayerNorm (lane axis)
    ctr = acc - mean
    var = jnp.mean(ctr * ctr, axis=-1, keepdims=True)
    # Dropout(p=0.5) is identity at inference time.
    return ctr * lax.rsqrt(var + LN_EPS) * gamma + beta


def variance_predictor_kernel(x_ref, mask_ref, w1_ref, w2_ref, vec_ref,
                              wlt_ref, bl_ref, o_ref):
    bb, seq_len, idim = x_ref.shape
    k_size = w1_ref.shape[0] // idim

    # Flatten the Bb batch elements into rows (sublane-aligned concat); the
    # time-index mask in _conv_relu_ln kills cross-sequence conv taps.
    if bb == 1:
        x = x_ref[0]
        t = lax.broadcasted_iota(jnp.int32, (seq_len, 1), 0)
    else:
        x = jnp.concatenate([x_ref[b] for b in range(bb)], axis=0)
        t_seq = lax.broadcasted_iota(jnp.int32, (seq_len, 1), 0)
        t = jnp.concatenate([t_seq] * bb, axis=0)

    b1, g1, be1 = vec_ref[0:1, :], vec_ref[1:2, :], vec_ref[2:3, :]
    b2, g2, be2 = vec_ref[3:4, :], vec_ref[4:5, :], vec_ref[5:6, :]

    h = _conv_relu_ln(x.astype(jnp.float32), w1_ref[...], b1, g1, be1,
                      t, seq_len, k_size)
    h = _conv_relu_ln(h, w2_ref[...], b2, g2, be2, t, seq_len, k_size)

    # Final Linear written lane-dense: out_b = W_l (odim, C) @ h_b^T (C, T).
    h_bf = h.astype(jnp.bfloat16)
    wlt = wlt_ref[...]                                   # (odim, C) bf16
    bl = bl_ref[...]                                     # (odim, 1) f32
    for b in range(bb):
        h_b = h_bf if bb == 1 else h_bf[b * seq_len:(b + 1) * seq_len, :]
        out_b = jnp.dot(wlt, h_b.T, preferred_element_type=jnp.float32)
        out_b = out_b + bl                               # (odim, T)
        out_b = jnp.where(mask_ref[b] != 0, 0.0, out_b)  # masked_fill
        o_ref[b] = out_b.astype(o_ref.dtype)


def _pick_batch_block(batch, seq_len, row_target=ROW_TARGET):
    """Largest divisor Bb of `batch` with Bb*T <= row_target (needs T % 8 == 0
    for the in-kernel row concat to stay sublane-aligned)."""
    if seq_len % 8 != 0:
        return 1
    best = 1
    for cand in range(1, batch + 1):
        if batch % cand == 0 and cand * seq_len <= max(row_target, seq_len):
            best = cand
    return best


def variance_predictor(xs, x_masks, params):
    """xs: (B, T, idim) f32; x_masks: (B, T) (nonzero = padded) or None.

    Returns (B, T, odim) float32 matching the PyTorch module in eval mode.
    """
    B, T, idim = xs.shape
    w1, w2, wl = params["w1"], params["w2"], params["wl"]
    K, _, n_chans = w1.shape
    odim = wl.shape[1]
    assert K % 2 == 1, "same-padding Conv1d requires an odd kernel size"

    bb = _pick_batch_block(B, T)
    grid = (B // bb,)

    # ---- parameter packing (checkpoint layout -> kernel layout, done once) ----
    # Conv weights: (K, C_in, C_out) -> (K*C_in, C_out) bf16 (fused im2col GEMM).
    # (From a PyTorch checkpoint: conv.weight (C_out, C_in, K).transpose(2,1,0).)
    w1m = w1.reshape(K * idim, n_chans).astype(jnp.bfloat16)
    w2m = w2.reshape(K * n_chans, n_chans).astype(jnp.bfloat16)
    # The six per-channel vectors ride in a single (8, C) f32 tile (one DMA).
    zrow = jnp.zeros((n_chans,), jnp.float32)
    vecpack = jnp.stack([params["b1"], params["g1"], params["be1"],
                         params["b2"], params["g2"], params["be2"],
                         zrow, zrow], axis=0)
    wlt = wl.T.astype(jnp.bfloat16)                      # (odim, n_chans)
    blc = params["bl"].reshape(odim, 1).astype(jnp.float32)

    if x_masks is None:
        masks = jnp.zeros((B, 1, T), jnp.int32)
    else:
        masks = x_masks.astype(jnp.int32)[:, None, :]    # (B, 1, T)

    out = pl.pallas_call(
        variance_predictor_kernel,
        out_shape=jax.ShapeDtypeStruct((B, odim, T), jnp.float32),
        grid_spec=pltpu.PrefetchScalarGridSpec(
            num_scalar_prefetch=0,
            grid=grid,
            in_specs=[
                pl.BlockSpec((bb, T, idim), lambda i: (i, 0, 0)),
                pl.BlockSpec((bb, 1, T), lambda i: (i, 0, 0)),
                pl.BlockSpec(w1m.shape, lambda i: (0, 0)),
                pl.BlockSpec(w2m.shape, lambda i: (0, 0)),
                pl.BlockSpec(vecpack.shape, lambda i: (0, 0)),
                pl.BlockSpec(wlt.shape, lambda i: (0, 0)),
                pl.BlockSpec(blc.shape, lambda i: (0, 0)),
            ],
            out_specs=pl.BlockSpec((bb, odim, T), lambda i: (i, 0, 0)),
        ),
        compiler_params=pltpu.CompilerParams(
            dimension_semantics=("parallel",),
            vmem_limit_bytes=48 * 1024 * 1024,
        ),
    )(xs.astype(jnp.float32), masks, w1m, w2m, vecpack, wlt, blc)

    # Kernel output is lane-dense (B, odim, T); present (B, T, odim) outside.
    return jnp.transpose(out, (0, 2, 1))


def make_params(key, idim, n_chans, kernel_size, odim):
    """Deterministic synthetic parameters in the natural (PyTorch-like) layout."""
    ks = jax.random.split(key, 10)
    n = jax.random.normal
    return dict(
        w1=0.1 * n(ks[0], (kernel_size, idim, n_chans), jnp.float32),
        b1=0.01 * n(ks[1], (n_chans,), jnp.float32),
        g1=1.0 + 0.05 * n(ks[2], (n_chans,), jnp.float32),
        be1=0.05 * n(ks[3], (n_chans,), jnp.float32),
        w2=0.1 * n(ks[4], (kernel_size, n_chans, n_chans), jnp.float32),
        b2=0.01 * n(ks[5], (n_chans,), jnp.float32),
        g2=1.0 + 0.05 * n(ks[6], (n_chans,), jnp.float32),
        be2=0.05 * n(ks[7], (n_chans,), jnp.float32),
        wl=0.1 * n(ks[8], (n_chans, odim), jnp.float32),
        bl=0.01 * n(ks[9], (odim,), jnp.float32),
    )


def reference_jax(xs, x_masks, params):
    """Plain-JAX (pure f32) reference reproducing the PyTorch forward (eval)."""
    T = xs.shape[1]

    def layer(h, w, b, g, be):
        K = w.shape[0]
        pad = (K - 1) // 2
        hp = jnp.pad(h, ((0, 0), (pad, pad), (0, 0)))
        y = sum(jnp.einsum("btc,cd->btd", hp[:, k:k + T], w[k]) for k in range(K))
        y = jnp.maximum(y + b, 0.0)
        mean = jnp.mean(y, -1, keepdims=True)
        var = jnp.mean((y - mean) ** 2, -1, keepdims=True)
        return (y - mean) / jnp.sqrt(var + LN_EPS) * g + be

    h = layer(xs, params["w1"], params["b1"], params["g1"], params["be1"])
    h = layer(h, params["w2"], params["b2"], params["g2"], params["be2"])
    out = jnp.einsum("btc,cd->btd", h, params["wl"]) + params["bl"]
    if x_masks is None:
        return out
    return jnp.where(x_masks[..., None] != 0, 0.0, out)


if __name__ == "__main__":
    B, T, idim, n_chans, kernel_size, odim = 2, 16, 32, 64, 3, 1

    key = jax.random.PRNGKey(0)
    k_x, k_p = jax.random.split(key)
    xs = jax.random.normal(k_x, (B, T, idim), jnp.float32)
    # last 3 frames of batch element 1 are padded
    x_masks = jnp.zeros((B, T), jnp.int32).at[1, T - 3:].set(1)

    params = make_params(k_p, idim, n_chans, kernel_size, odim)

    out = jax.jit(variance_predictor)(xs, x_masks, params)
    out = jax.block_until_ready(out)

    ref = reference_jax(xs, x_masks, params)
    assert out.shape == (B, T, odim)
    # Matmuls use bf16 operands (f32 accumulation / LayerNorm), so the
    # tolerance vs. the pure-f32 reference is loosened accordingly.
    assert jnp.allclose(out, ref, atol=5e-2, rtol=5e-2), \
        f"max abs err {float(jnp.max(jnp.abs(out - ref)))}"

    print("KERNEL_OK")
</pallas_src>

<mosaic_0001>
module attributes {stable_mosaic.version = 11 : i64} {
  func.func @variance_predictor_kernel(%arg0: i32, %arg1: memref<2x16x32xf32, #tpu.memory_space<vmem>>, %arg2: memref<2x1x16xi32, #tpu.memory_space<vmem>>, %arg3: memref<96x64xbf16, #tpu.memory_space<vmem>>, %arg4: memref<192x64xbf16, #tpu.memory_space<vmem>>, %arg5: memref<8x64xf32, #tpu.memory_space<vmem>>, %arg6: memref<1x64xbf16, #tpu.memory_space<vmem>>, %arg7: memref<1x1xf32, #tpu.memory_space<vmem>>, %arg8: memref<2x1x16xf32, #tpu.memory_space<vmem>>) attributes {dimension_semantics = [#tpu.dimension_semantics<parallel>], iteration_bounds = array<i64: 1>, scalar_prefetch = 0 : i64, scratch_operands = 0 : i64, tpu.core_type = #tpu.core_type<tc>, window_params = [{transform_indices = @transform_0, window_bounds = array<i64: 2, 16, 32>}, {transform_indices = @transform_1, window_bounds = array<i64: 2, 1, 16>}, {pipeline_mode = #tpu.pipeline_mode<synchronous>, transform_indices = @transform_2, window_bounds = array<i64: 96, 64>}, {pipeline_mode = #tpu.pipeline_mode<synchronous>, transform_indices = @transform_3, window_bounds = array<i64: 192, 64>}, {pipeline_mode = #tpu.pipeline_mode<synchronous>, transform_indices = @transform_4, window_bounds = array<i64: 8, 64>}, {pipeline_mode = #tpu.pipeline_mode<synchronous>, transform_indices = @transform_5, window_bounds = array<i64: 1, 64>}, {pipeline_mode = #tpu.pipeline_mode<synchronous>, transform_indices = @transform_6, window_bounds = array<i64: 1, 1>}, {transform_indices = @transform_7, window_bounds = array<i64: 2, 1, 16>}]} {
    %c0 = arith.constant 0 : index
    %c0_0 = arith.constant 0 : index
    %c0_1 = arith.constant 0 : index
    %0 = vector.load %arg1[%c0, %c0_0, %c0_1] : memref<2x16x32xf32, #tpu.memory_space<vmem>>, vector<1x16x32xf32>
    %1 = vector.shape_cast %0 : vector<1x16x32xf32> to vector<16x32xf32>
    %c1 = arith.constant 1 : index
    %c0_2 = arith.constant 0 : index
    %c0_3 = arith.constant 0 : index
    %2 = vector.load %arg1[%c1, %c0_2, %c0_3] : memref<2x16x32xf32, #tpu.memory_space<vmem>>, vector<1x16x32xf32>
    %3 = vector.shape_cast %2 : vector<1x16x32xf32> to vector<16x32xf32>
    %4 = tpu.concatenate %1, %3 in 0 : vector<16x32xf32>, vector<16x32xf32> -> vector<32x32xf32>
    %5 = tpu.iota {dimensions = array<i32: 0>} : vector<16x1xi32>
    %6 = tpu.concatenate %5, %5 in 0 : vector<16x1xi32>, vector<16x1xi32> -> vector<32x1xi32>
    %c0_4 = arith.constant 0 : index
    %c0_5 = arith.constant 0 : index
    %7 = vector.load %arg5[%c0_4, %c0_5] : memref<8x64xf32, #tpu.memory_space<vmem>>, vector<1x64xf32>
    %c1_6 = arith.constant 1 : index
    %c0_7 = arith.constant 0 : index
    %8 = vector.load %arg5[%c1_6, %c0_7] : memref<8x64xf32, #tpu.memory_space<vmem>>, vector<1x64xf32>
    %c2 = arith.constant 2 : index
    %c0_8 = arith.constant 0 : index
    %9 = vector.load %arg5[%c2, %c0_8] : memref<8x64xf32, #tpu.memory_space<vmem>>, vector<1x64xf32>
    %c3 = arith.constant 3 : index
    %c0_9 = arith.constant 0 : index
    %10 = vector.load %arg5[%c3, %c0_9] : memref<8x64xf32, #tpu.memory_space<vmem>>, vector<1x64xf32>
    %c4 = arith.constant 4 : index
    %c0_10 = arith.constant 0 : index
    %11 = vector.load %arg5[%c4, %c0_10] : memref<8x64xf32, #tpu.memory_space<vmem>>, vector<1x64xf32>
    %c5 = arith.constant 5 : index
    %c0_11 = arith.constant 0 : index
    %12 = vector.load %arg5[%c5, %c0_11] : memref<8x64xf32, #tpu.memory_space<vmem>>, vector<1x64xf32>
    %c0_12 = arith.constant 0 : index
    %c0_13 = arith.constant 0 : index
    %13 = vector.load %arg3[%c0_12, %c0_13] : memref<96x64xbf16, #tpu.memory_space<vmem>>, vector<96x64xbf16>
    %c1_i32 = arith.constant 1 : i32
    %14 = tpu.dynamic_rotate %4 by %c1_i32 dim 0 : vector<32x32xf32>, i32 -> vector<32x32xf32>
    %c-1_i32 = arith.constant -1 : i32
    %15 = vector.broadcast %c-1_i32 : i32 to vector<32x1xi32>
    %16 = arith.addi %6, %15 : vector<32x1xi32>
    %c0_i32 = arith.constant 0 : i32
    %17 = vector.broadcast %c0_i32 : i32 to vector<32x1xi32>
    %18 = arith.cmpi sge, %16, %17 : vector<32x1xi32>
    %c-1_i32_14 = arith.constant -1 : i32
    %19 = vector.broadcast %c-1_i32_14 : i32 to vector<32x1xi32>
    %20 = arith.addi %6, %19 : vector<32x1xi32>
    %c16_i32 = arith.constant 16 : i32
    %21 = vector.broadcast %c16_i32 : i32 to vector<32x1xi32>
    %22 = arith.cmpi slt, %20, %21 : vector<32x1xi32>
    %23 = arith.andi %18, %22 : vector<32x1xi1>
    %cst = arith.constant 0.000000e+00 : f32
    %24 = vector.shape_cast %23 : vector<32x1xi1> to vector<32x1xi1>
    %25 = vector.broadcast %24 : vector<32x1xi1> to vector<32x32xi1>
    %26 = vector.broadcast %cst : f32 to vector<32x32xf32>
    %27 = arith.select %25, %14, %26 : vector<32x32xi1>, vector<32x32xf32>
    %c31_i32 = arith.constant 31 : i32
    %28 = tpu.dynamic_rotate %4 by %c31_i32 dim 0 : vector<32x32xf32>, i32 -> vector<32x32xf32>
    %c1_i32_15 = arith.constant 1 : i32
    %29 = vector.broadcast %c1_i32_15 : i32 to vector<32x1xi32>
    %30 = arith.addi %6, %29 : vector<32x1xi32>
    %c0_i32_16 = arith.constant 0 : i32
    %31 = vector.broadcast %c0_i32_16 : i32 to vector<32x1xi32>
    %32 = arith.cmpi sge, %30, %31 : vector<32x1xi32>
    %c1_i32_17 = arith.constant 1 : i32
    %33 = vector.broadcast %c1_i32_17 : i32 to vector<32x1xi32>
    %34 = arith.addi %6, %33 : vector<32x1xi32>
    %c16_i32_18 = arith.constant 16 : i32
    %35 = vector.broadcast %c16_i32_18 : i32 to vector<32x1xi32>
    %36 = arith.cmpi slt, %34, %35 : vector<32x1xi32>
    %37 = arith.andi %32, %36 : vector<32x1xi1>
    %cst_19 = arith.constant 0.000000e+00 : f32
    %38 = vector.shape_cast %37 : vector<32x1xi1> to vector<32x1xi1>
    %39 = vector.broadcast %38 : vector<32x1xi1> to vector<32x32xi1>
    %40 = vector.broadcast %cst_19 : f32 to vector<32x32xf32>
    %41 = arith.select %39, %28, %40 : vector<32x32xi1>, vector<32x32xf32>
    %42 = tpu.concatenate %27, %4, %41 in 1 : vector<32x32xf32>, vector<32x32xf32>, vector<32x32xf32> -> vector<32x96xf32>
    %43 = arith.truncf %42 : vector<32x96xf32> to vector<32x96xbf16>
    %cst_20 = arith.constant dense<0.000000e+00> : vector<32x64xf32>
    %44 = tpu.matmul %43, %13, %cst_20 {dimension_numbers = #tpu.dot_dimension_numbers<[1], [0], [0], [1], [0, 0, 1, 1], [], []>} : vector<32x96xbf16>, vector<96x64xbf16>, vector<32x64xf32> -> vector<32x64xf32>
    %45 = vector.broadcast %7 : vector<1x64xf32> to vector<32x64xf32>
    %46 = arith.addf %44, %45 : vector<32x64xf32>
    %cst_21 = arith.constant 0.000000e+00 : f32
    %47 = vector.broadcast %cst_21 : f32 to vector<32x64xf32>
    %48 = arith.maximumf %46, %47 : vector<32x64xf32>
    %cst_22 = arith.constant dense<0.000000e+00> : vector<32xf32>
    %49 = vector.multi_reduction <add>, %48, %cst_22 [1] : vector<32x64xf32> to vector<32xf32>
    %50 = vector.shape_cast %49 : vector<32xf32> to vector<32x1xf32>
    %cst_23 = arith.constant 6.400000e+01 : f32
    %51 = vector.broadcast %cst_23 : f32 to vector<32x1xf32>
    %52 = arith.divf %50, %51 : vector<32x1xf32>
    %53 = vector.broadcast %52 : vector<32x1xf32> to vector<32x64xf32>
    %54 = arith.subf %48, %53 : vector<32x64xf32>
    %55 = arith.mulf %54, %54 : vector<32x64xf32>
    %cst_24 = arith.constant dense<0.000000e+00> : vector<32xf32>
    %56 = vector.multi_reduction <add>, %55, %cst_24 [1] : vector<32x64xf32> to vector<32xf32>
    %57 = vector.shape_cast %56 : vector<32xf32> to vector<32x1xf32>
    %cst_25 = arith.constant 6.400000e+01 : f32
    %58 = vector.broadcast %cst_25 : f32 to vector<32x1xf32>
    %59 = arith.divf %57, %58 : vector<32x1xf32>
    %cst_26 = arith.constant 9.99999974E-6 : f32
    %60 = vector.broadcast %cst_26 : f32 to vector<32x1xf32>
    %61 = arith.addf %59, %60 : vector<32x1xf32>
    %62 = math.rsqrt %61 : vector<32x1xf32>
    %63 = vector.broadcast %62 : vector<32x1xf32> to vector<32x64xf32>
    %64 = arith.mulf %54, %63 : vector<32x64xf32>
    %65 = vector.broadcast %8 : vector<1x64xf32> to vector<32x64xf32>
    %66 = arith.mulf %64, %65 : vector<32x64xf32>
    %67 = vector.broadcast %9 : vector<1x64xf32> to vector<32x64xf32>
    %68 = arith.addf %66, %67 : vector<32x64xf32>
    %c0_27 = arith.constant 0 : index
    %c0_28 = arith.constant 0 : index
    %69 = vector.load %arg4[%c0_27, %c0_28] : memref<192x64xbf16, #tpu.memory_space<vmem>>, vector<192x64xbf16>
    %c1_i32_29 = arith.constant 1 : i32
    %70 = tpu.dynamic_rotate %68 by %c1_i32_29 dim 0 : vector<32x64xf32>, i32 -> vector<32x64xf32>
    %c-1_i32_30 = arith.constant -1 : i32
    %71 = vector.broadcast %c-1_i32_30 : i32 to vector<32x1xi32>
    %72 = arith.addi %6, %71 : vector<32x1xi32>
    %c0_i32_31 = arith.constant 0 : i32
    %73 = vector.broadcast %c0_i32_31 : i32 to vector<32x1xi32>
    %74 = arith.cmpi sge, %72, %73 : vector<32x1xi32>
    %c-1_i32_32 = arith.constant -1 : i32
    %75 = vector.broadcast %c-1_i32_32 : i32 to vector<32x1xi32>
    %76 = arith.addi %6, %75 : vector<32x1xi32>
    %c16_i32_33 = arith.constant 16 : i32
    %77 = vector.broadcast %c16_i32_33 : i32 to vector<32x1xi32>
    %78 = arith.cmpi slt, %76, %77 : vector<32x1xi32>
    %79 = arith.andi %74, %78 : vector<32x1xi1>
    %cst_34 = arith.constant 0.000000e+00 : f32
    %80 = vector.shape_cast %79 : vector<32x1xi1> to vector<32x1xi1>
    %81 = vector.broadcast %80 : vector<32x1xi1> to vector<32x64xi1>
    %82 = vector.broadcast %cst_34 : f32 to vector<32x64xf32>
    %83 = arith.select %81, %70, %82 : vector<32x64xi1>, vector<32x64xf32>
    %c31_i32_35 = arith.constant 31 : i32
    %84 = tpu.dynamic_rotate %68 by %c31_i32_35 dim 0 : vector<32x64xf32>, i32 -> vector<32x64xf32>
    %c1_i32_36 = arith.constant 1 : i32
    %85 = vector.broadcast %c1_i32_36 : i32 to vector<32x1xi32>
    %86 = arith.addi %6, %85 : vector<32x1xi32>
    %c0_i32_37 = arith.constant 0 : i32
    %87 = vector.broadcast %c0_i32_37 : i32 to vector<32x1xi32>
    %88 = arith.cmpi sge, %86, %87 : vector<32x1xi32>
    %c1_i32_38 = arith.constant 1 : i32
    %89 = vector.broadcast %c1_i32_38 : i32 to vector<32x1xi32>
    %90 = arith.addi %6, %89 : vector<32x1xi32>
    %c16_i32_39 = arith.constant 16 : i32
    %91 = vector.broadcast %c16_i32_39 : i32 to vector<32x1xi32>
    %92 = arith.cmpi slt, %90, %91 : vector<32x1xi32>
    %93 = arith.andi %88, %92 : vector<32x1xi1>
    %cst_40 = arith.constant 0.000000e+00 : f32
    %94 = vector.shape_cast %93 : vector<32x1xi1> to vector<32x1xi1>
    %95 = vector.broadcast %94 : vector<32x1xi1> to vector<32x64xi1>
    %96 = vector.broadcast %cst_40 : f32 to vector<32x64xf32>
    %97 = arith.select %95, %84, %96 : vector<32x64xi1>, vector<32x64xf32>
    %98 = tpu.concatenate %83, %68, %97 in 1 : vector<32x64xf32>, vector<32x64xf32>, vector<32x64xf32> -> vector<32x192xf32>
    %99 = arith.truncf %98 : vector<32x192xf32> to vector<32x192xbf16>
    %cst_41 = arith.constant dense<0.000000e+00> : vector<32x64xf32>
    %100 = tpu.matmul %99, %69, %cst_41 {dimension_numbers = #tpu.dot_dimension_numbers<[1], [0], [0], [1], [0, 0, 1, 1], [], []>} : vector<32x192xbf16>, vector<192x64xbf16>, vector<32x64xf32> -> vector<32x64xf32>
    %101 = vector.broadcast %10 : vector<1x64xf32> to vector<32x64xf32>
    %102 = arith.addf %100, %101 : vector<32x64xf32>
    %cst_42 = arith.constant 0.000000e+00 : f32
    %103 = vector.broadcast %cst_42 : f32 to vector<32x64xf32>
    %104 = arith.maximumf %102, %103 : vector<32x64xf32>
    %cst_43 = arith.constant dense<0.000000e+00> : vector<32xf32>
    %105 = vector.multi_reduction <add>, %104, %cst_43 [1] : vector<32x64xf32> to vector<32xf32>
    %106 = vector.shape_cast %105 : vector<32xf32> to vector<32x1xf32>
    %cst_44 = arith.constant 6.400000e+01 : f32
    %107 = vector.broadcast %cst_44 : f32 to vector<32x1xf32>
    %108 = arith.divf %106, %107 : vector<32x1xf32>
    %109 = vector.broadcast %108 : vector<32x1xf32> to vector<32x64xf32>
    %110 = arith.subf %104, %109 : vector<32x64xf32>
    %111 = arith.mulf %110, %110 : vector<32x64xf32>
    %cst_45 = arith.constant dense<0.000000e+00> : vector<32xf32>
    %112 = vector.multi_reduction <add>, %111, %cst_45 [1] : vector<32x64xf32> to vector<32xf32>
    %113 = vector.shape_cast %112 : vector<32xf32> to vector<32x1xf32>
    %cst_46 = arith.constant 6.400000e+01 : f32
    %114 = vector.broadcast %cst_46 : f32 to vector<32x1xf32>
    %115 = arith.divf %113, %114 : vector<32x1xf32>
    %cst_47 = arith.constant 9.99999974E-6 : f32
    %116 = vector.broadcast %cst_47 : f32 to vector<32x1xf32>
    %117 = arith.addf %115, %116 : vector<32x1xf32>
    %118 = math.rsqrt %117 : vector<32x1xf32>
    %119 = vector.broadcast %118 : vector<32x1xf32> to vector<32x64xf32>
    %120 = arith.mulf %110, %119 : vector<32x64xf32>
    %121 = vector.broadcast %11 : vector<1x64xf32> to vector<32x64xf32>
    %122 = arith.mulf %120, %121 : vector<32x64xf32>
    %123 = vector.broadcast %12 : vector<1x64xf32> to vector<32x64xf32>
    %124 = arith.addf %122, %123 : vector<32x64xf32>
    %125 = arith.truncf %124 : vector<32x64xf32> to vector<32x64xbf16>
    %c0_48 = arith.constant 0 : index
    %c0_49 = arith.constant 0 : index
    %126 = vector.load %arg6[%c0_48, %c0_49] : memref<1x64xbf16, #tpu.memory_space<vmem>>, vector<1x64xbf16>
    %c0_50 = arith.constant 0 : index
    %c0_51 = arith.constant 0 : index
    %127 = vector.load %arg7[%c0_50, %c0_51] : memref<1x1xf32, #tpu.memory_space<vmem>>, vector<1x1xf32>
    %128 = vector.extract_strided_slice %125 {offsets = [0, 0], sizes = [16, 64], strides = [1, 1]} : vector<32x64xbf16> to vector<16x64xbf16>
    %129 = tpu.transpose %128, [1, 0] : vector<16x64xbf16> -> vector<64x16xbf16>
    %cst_52 = arith.constant dense<0.000000e+00> : vector<1x16xf32>
    %130 = tpu.matmul %126, %129, %cst_52 {dimension_numbers = #tpu.dot_dimension_numbers<[1], [0], [0], [1], [0, 0, 1, 1], [], []>} : vector<1x64xbf16>, vector<64x16xbf16>, vector<1x16xf32> -> vector<1x16xf32>
    %131 = vector.broadcast %127 : vector<1x1xf32> to vector<1x16xf32>
    %132 = arith.addf %130, %131 : vector<1x16xf32>
    %c0_53 = arith.constant 0 : index
    %c0_54 = arith.constant 0 : index
    %c0_55 = arith.constant 0 : index
    %133 = vector.load %arg2[%c0_53, %c0_54, %c0_55] : memref<2x1x16xi32, #tpu.memory_space<vmem>>, vector<1x1x16xi32>
    %134 = vector.shape_cast %133 : vector<1x1x16xi32> to vector<1x16xi32>
    %c0_i32_56 = arith.constant 0 : i32
    %135 = vector.broadcast %c0_i32_56 : i32 to vector<1x16xi32>
    %136 = arith.cmpi ne, %134, %135 : vector<1x16xi32>
    %cst_57 = arith.constant 0.000000e+00 : f32
    %137 = vector.broadcast %cst_57 : f32 to vector<1x16xf32>
    %138 = arith.select %136, %137, %132 : vector<1x16xi1>, vector<1x16xf32>
    %c0_58 = arith.constant 0 : index
    %c0_59 = arith.constant 0 : index
    %c0_60 = arith.constant 0 : index
    %139 = vector.load %arg8[%c0_58, %c0_59, %c0_60] : memref<2x1x16xf32, #tpu.memory_space<vmem>>, vector<1x1x16xf32>
    %140 = vector.shape_cast %139 : vector<1x1x16xf32> to vector<1x16xf32>
    %141 = vector.shape_cast %138 : vector<1x16xf32> to vector<1x1x16xf32>
    tpu.vector_store %arg8[%c0_58, %c0_59, %c0_60], %141 {strides = array<i32>} : memref<2x1x16xf32, #tpu.memory_space<vmem>>, vector<1x1x16xf32>,
    %142 = vector.extract_strided_slice %125 {offsets = [16, 0], sizes = [16, 64], strides = [1, 1]} : vector<32x64xbf16> to vector<16x64xbf16>
    %143 = tpu.transpose %142, [1, 0] : vector<16x64xbf16> -> vector<64x16xbf16>
    %cst_61 = arith.constant dense<0.000000e+00> : vector<1x16xf32>
    %144 = tpu.matmul %126, %143, %cst_61 {dimension_numbers = #tpu.dot_dimension_numbers<[1], [0], [0], [1], [0, 0, 1, 1], [], []>} : vector<1x64xbf16>, vector<64x16xbf16>, vector<1x16xf32> -> vector<1x16xf32>
    %145 = vector.broadcast %127 : vector<1x1xf32> to vector<1x16xf32>
    %146 = arith.addf %144, %145 : vector<1x16xf32>
    %c1_62 = arith.constant 1 : index
    %c0_63 = arith.constant 0 : index
    %c0_64 = arith.constant 0 : index
    %147 = vector.load %arg2[%c1_62, %c0_63, %c0_64] : memref<2x1x16xi32, #tpu.memory_space<vmem>>, vector<1x1x16xi32>
    %148 = vector.shape_cast %147 : vector<1x1x16xi32> to vector<1x16xi32>
    %c0_i32_65 = arith.constant 0 : i32
    %149 = vector.broadcast %c0_i32_65 : i32 to vector<1x16xi32>
    %150 = arith.cmpi ne, %148, %149 : vector<1x16xi32>
    %cst_66 = arith.constant 0.000000e+00 : f32
    %151 = vector.broadcast %cst_66 : f32 to vector<1x16xf32>
    %152 = arith.select %150, %151, %146 : vector<1x16xi1>, vector<1x16xf32>
    %c1_67 = arith.constant 1 : index
    %c0_68 = arith.constant 0 : index
    %c0_69 = arith.constant 0 : index
    %153 = vector.load %arg8[%c1_67, %c0_68, %c0_69] : memref<2x1x16xf32, #tpu.memory_space<vmem>>, vector<1x1x16xf32>
    %154 = vector.shape_cast %153 : vector<1x1x16xf32> to vector<1x16xf32>
    %155 = vector.shape_cast %152 : vector<1x16xf32> to vector<1x1x16xf32>
    tpu.vector_store %arg8[%c1_67, %c0_68, %c0_69], %155 {strides = array<i32>} : memref<2x1x16xf32, #tpu.memory_space<vmem>>, vector<1x1x16xf32>,
    return
  }
  func.func @transform_0(%arg0: i32) -> (i32, i32, i32) {
    %c0_i32 = arith.constant 0 : i32
    %c0_i32_0 = arith.constant 0 : i32
    %c0_i32_1 = arith.constant 0 : i32
    return %arg0, %c0_i32, %c0_i32_0 : i32, i32, i32
  }
  func.func @transform_1(%arg0: i32) -> (i32, i32, i32) {
    %c0_i32 = arith.constant 0 : i32
    %c0_i32_0 = arith.constant 0 : i32
    %c0_i32_1 = arith.constant 0 : i32
    return %arg0, %c0_i32, %c0_i32_0 : i32, i32, i32
  }
  func.func @transform_2(%arg0: i32) -> (i32, i32) {
    %c0_i32 = arith.constant 0 : i32
    %c0_i32_0 = arith.constant 0 : i32
    %c0_i32_1 = arith.constant 0 : i32
    return %c0_i32, %c0_i32_0 : i32, i32
  }
  func.func @transform_3(%arg0: i32) -> (i32, i32) {
    %c0_i32 = arith.constant 0 : i32
    %c0_i32_0 = arith.constant 0 : i32
    %c0_i32_1 = arith.constant 0 : i32
    return %c0_i32, %c0_i32_0 : i32, i32
  }
  func.func @transform_4(%arg0: i32) -> (i32, i32) {
    %c0_i32 = arith.constant 0 : i32
    %c0_i32_0 = arith.constant 0 : i32
    %c0_i32_1 = arith.constant 0 : i32
    return %c0_i32, %c0_i32_0 : i32, i32
  }
  func.func @transform_5(%arg0: i32) -> (i32, i32) {
    %c0_i32 = arith.constant 0 : i32
    %c0_i32_0 = arith.constant 0 : i32
    %c0_i32_1 = arith.constant 0 : i32
    return %c0_i32, %c0_i32_0 : i32, i32
  }
  func.func @transform_6(%arg0: i32) -> (i32, i32) {
    %c0_i32 = arith.constant 0 : i32
    %c0_i32_0 = arith.constant 0 : i32
    %c0_i32_1 = arith.constant 0 : i32
    return %c0_i32, %c0_i32_0 : i32, i32
  }
  func.func @transform_7(%arg0: i32) -> (i32, i32, i32) {
    %c0_i32 = arith.constant 0 : i32
    %c0_i32_0 = arith.constant 0 : i32
    %c0_i32_1 = arith.constant 0 : i32
    return %arg0, %c0_i32, %c0_i32_0 : i32, i32, i32
  }
}

</mosaic_0001>

<bundles_post_ra>
// kernel: variance_predictor.1
= control target key start
LH: loop header
LB: loop body
LE: loop exit
PB: predicated region body
PF: predicated region fallthrough
CT: control target
= control target key end

     0   :  { %s1214_s0 = inlined_call_operand.vmem [shape: f32[2,16,32], index: 0, kind: input, shape index: {}]   ;;  %s1215_s1 = inlined_call_operand.vmem [shape: s32[2,1,16], index: 1, kind: input, shape index: {}]   ;;  %s1216_s2 = inlined_call_operand.vmem [shape: bf16[96,64], index: 2, kind: input, shape index: {}]   ;;  %s1217_s3 = inlined_call_operand.vmem [shape: bf16[192,64], index: 3, kind: input, shape index: {}]   ;;  %s1218_s4 = inlined_call_operand.vmem [shape: f32[8,64], index: 4, kind: input, shape index: {}]   ;;  %s1219_s5 = inlined_call_operand.vmem [shape: bf16[1,64], index: 5, kind: input, shape index: {}]   ;;  %s1220_s6 = inlined_call_operand.<no memory space> [shape: f32[1,1], index: 6, kind: input, shape index: {}]   ;;  %s1221_s7 = inlined_call_operand.hbm [shape: f32[2,1,16], index: 7, kind: output, shape index: {}]  }
   0x1   :  { %v12_v0 = vstv %s1220_s6 }
   0x2   :  { %13 = vst [vmem:[#allocation2] sm:$0x1] %v12_v0 }
   0x3   :  { %v35_v1 = vlaneseq  ;;  %v735_v2 = vld [vmem:[%s1214_s0 + $0x10] sm:$0xff]  ;;  %v736_v3 = vld [vmem:[%s1214_s0 + $0x18] sm:$0xff]  ;;  %v905_v4 = vmov 0   ;;  %v30_v6 = vld [vmem:[%s1214_s0] sm:$0xff]  ;;  %v906_v8 = vmov 1   ;;  %s907_s13 = smov 32  }
   0x4   :  { %817 = vset.pattern.permute.xlu0 %v905_v4  ;;  %818 = vset.pattern.permute.xlu1 %v905_v4  ;;  %v90_v5 = vrot.slane %v736_v3, 1  ;;  %v31_v7 = vld [vmem:[%s1214_s0 + $0x8] sm:$0xff]  ;;  %v59_v10 = vrot.slane %v736_v3, 7  ;;  %v89_v11 = vrot.slane %v735_v2, 1  ;;  %v58_v13 = vrot.slane %v735_v2, 7  ;;  %v850_v28 = vld [vmem:[%s1216_s2 + $0x20] sm:$0xff]  }
   0x5   :  { %107 = vperm.xlu0 %817, %v906_v8   ;;  %v971_v9 = vshrl.u32 %v35_v1, 7  ;;  %v88_v12 = vrot.slane %v31_v7, 1  ;;  %485 = vmatprep.subr.bf16.mxu1 %v905_v4  ;;  %v87_v14 = vrot.slane %v30_v6, 1  ;;  %v57_v17 = vrot.slane %v31_v7, 7  ;;  %v849_v27 = vld [vmem:[%s1216_s2 + $0x28] sm:$0xff]   ;;  %v851_v34 = vld [vmem:[%s1216_s2 + $0x18] sm:$0xff]  }
   0x6   :  { %v56_v24 = vrot.slane %v30_v6, 7  ;;  %v819_v26 = vpack.i.bf16 %v31_v7, %v30_v6  ;;  %v824_v33 = vpack.i.bf16 %v736_v3, %v735_v2  ;;  %780 = vmatprep.subr.bf16.mxu0 %v849_v27  ;;  %v852_v35 = vld [vmem:[%s1216_s2 + $0x10] sm:$0xff]  }
   0x7   :  { %v37_v15 = vadd.s32 8, %v971_v9  ;;  %v65_v16 = vadd.s32 4294967295, %v971_v9  ;;  %vm91_vm0 = vcmp.lt.s32.totalorder %v971_v9, 7  ;;  %vm60_vm3 = vcmp.lt.s32.totalorder %v971_v9, 1  ;;  %781 = vmatpush3.bf16.msra.mxu0 %v849_v27 }
   0x8   :  { %v92_v18 = vsel %vm91_vm0, %v89_v11, %v90_v5  ;;  %v94_v19 = vsel %vm91_vm0, %v87_v14, %v88_v12  ;;  %v93_v20 = vsel %vm91_vm0, %v88_v12, %v89_v11  ;;  %v95_v21 = vsel %vm91_vm0, %v90_v5, %v87_v14  ;;  %782 = vmatprep.subr.bf16.mxu0 %v850_v28 }
   0x9   :  { %v97_v22 = vadd.s32 1, %v37_v15  ;;  %vm67_vm1 = vcmp.ge.s32.totalorder %v65_v16, 0  ;;  %v62_v29 = vsel %vm60_vm3, %v57_v17, %v58_v13  ;;  %v64_v30 = vsel %vm60_vm3, %v59_v10, %v56_v24 }
   0xa   :  { %v73_v23 = vsel %vm67_vm1, 1, %v905_v4  ;;  %v61_v31 = vsel %vm60_vm3, %v58_v13, %v59_v10  ;;  %v63_v32 = vsel %vm60_vm3, %v56_v24, %v57_v17 }
   0xb   :  { %vm101_vm2 = vcmp.lt.s32.totalorder %v97_v22, 16  ;;  %76 = vperm.xlu1 %818, %v73_v23   ;;  %783 = vmatpush3.bf16.msra.mxu0 %v850_v28 }
   0xc   :  { %v105_v25 = vsel %vm101_vm2, 1, %v905_v4  ;;  %784 = vmatprep.subr.bf16.mxu0 %v851_v34 }
   0xd   :  { %110 = vperm.xlu0 %817, %v105_v25  }
   0xf   :  { %79 = vperm.xlu1 %818, %v906_v8  }
  0x11   :  { %820 = vrot.lane.b32.xlu0 %v819_v26, %s907_s13 }
  0x13   :  { %825 = vrot.lane.b32.xlu1 %v824_v33, %s907_s13 }
  0x14   :  { %14 = vsyncpa [#allocation4], 0  ;;  %785 = vmatpush3.bf16.msra.mxu0 %v851_v34  ;;  %v853_v36 = vld [vmem:[%s1216_s2 + $0x8] sm:$0xff]   ;;  %v854_v37 = vld [vmem:[%s1216_s2] sm:$0xff]   ;;  %s908_s2 = smov 64   ;;  %vm150_vm8 = vcmask 261120  }
  0x15   :  { %786 = vmatprep.subr.bf16.mxu0 %v852_v35  ;;  %vm155_vm9 = vcmask 523264   ;;  %vm202_vm10 = vcmask 785408   ;;  %v737_v13 = vld [vmem:[%s1218_s4] ss:$0 sm:$0xff]  ;;  %vm910_vm11 = vmmov 0   ;;  %vm668_vm13 = vcmask 122880  }
  0x16   :  { %s911_s10 = smov [#allocation3]  }
  0x17   :  { %s724_s11 = sshll.u32 %s911_s10, 4  ;;  %s725_s11 = int_to_ptr.vmem [resolvable:$true] %s724_s11 }
  0x18   :  { %787 = vmatpush3.bf16.msra.mxu0 %v852_v35  ;;  %s883_s12 = scalar_lea.vmem %s725_s11, 32  ;;  %p888_p1 = scmp.lt.s32.totalorder %s725_s11, %s725_s11 }
  0x19   :  { %788 = vmatprep.subr.bf16.mxu0 %v853_v36  ;;  %p884_p0 = scmp.ne.s32.totalorder %s725_s11, %s883_s12  ;;  %p889_p2 = scmp.lt.s32.totalorder %s883_s12, %s883_s12 }
  0x1b   :  { %p890_p3 = por %p889_p2, %p888_p1 }
  0x1c   :  { %789 = vmatpush3.bf16.msra.mxu0 %v853_v36 }
  0x1d   :  { %790 = vmatprep.subr.bf16.mxu0 %v854_v37  ;;  %p891_p4 = pnand %p890_p3, %p884_p0 }
  0x20   :  { %791 = vmatpush3.bf16.msra.mxu0 %v854_v37 }
  0x80   :  { %v1014_v38 = vpop.permute.xlu0 %107 }
  0x81   :  { %vm112_vm4 = vcmp.eq.s32.totalorder %v1014_v38, 1 }
  0x82   :  { %v114_v40 = vsel %vm112_vm4, %v94_v19, 0.0  ;;  %v116_v41 = vsel %vm112_vm4, %v92_v18, 0.0 }
  0x86   :  { %v1030_v46 = vpop.permute.xlu1 %76 }
  0x87   :  { %vm81_vm6 = vcmp.eq.s32.totalorder %v1030_v46, 1 }
  0x88   :  { %v1017_v39 = vpop.permute.xlu0 %110  ;;  %v83_v54 = vsel %vm81_vm6, %v64_v30, 0.0  ;;  %v85_v55 = vsel %vm81_vm6, %v62_v29, 0.0 }
  0x89   :  { %vm113_vm5 = vcmp.eq.s32.totalorder %v1017_v39, 1 }
  0x8a   :  { %v115_v42 = vsel %vm113_vm5, %v93_v20, 0.0  ;;  %v117_v43 = vsel %vm113_vm5, %v95_v21, 0.0  ;;  %v1032_v47 = vpop.permute.xlu1 %79 }
  0x8b   :  { %v834_v44 = vpack.i.bf16 %v117_v43, %v116_v41  ;;  %v829_v45 = vpack.i.bf16 %v115_v42, %v114_v40  ;;  %vm82_vm7 = vcmp.eq.s32.totalorder %v1032_v47, 1 }
  0x8c   :  { %v821_v49 = vpop.permute.xlu0 %820  ;;  %v84_v56 = vsel %vm82_vm7, %v63_v32, 0.0  ;;  %v86_v57 = vsel %vm82_vm7, %v61_v31, 0.0 }
  0x8d   :  { %835 = vrot.lane.b32.xlu1 %v834_v44, %s908_s2  ;;  %830 = vrot.lane.b32.xlu0 %v829_v45, %s908_s2  ;;  %v823_v52 = vunpack.i.h.bf16 %v821_v49  ;;  %v822_v53 = vunpack.i.l.bf16 %v821_v49 }
  0x8e   :  { %v826_v48 = vpop.permute.xlu1 %825 }
  0x8f   :  { %v828_v50 = vunpack.i.h.bf16 %v826_v48  ;;  %v827_v51 = vunpack.i.l.bf16 %v826_v48  ;;  %v151_v2 = vsel %vm150_vm8, %v83_v54, %v822_v53  ;;  %v152_v3 = vsel %vm150_vm8, %v84_v56, %v823_v52  ;;  %v855_v53 = vld [vmem:[%s1217_s3 + $0x38] sm:$0xff]   ;;  %v856_v54 = vld [vmem:[%s1217_s3 + $0x30] sm:$0xff]   ;;  %v858_v56 = vld [vmem:[%s1217_s3 + $0x20] sm:$0xff]  }
  0x90   :  { %486 = vmatpush1.bf16.msra.mxu1 %v855_v53 }
  0x91   :  { %v153_v0 = vsel %vm150_vm8, %v85_v55, %v827_v51  ;;  %v154_v1 = vsel %vm150_vm8, %v86_v57, %v828_v50  ;;  %487 = vmatprep.subr.bf16.mxu1 %v905_v4  ;;  %v857_v55 = vld [vmem:[%s1217_s3 + $0x28] sm:$0xff]   ;;  %v859_v57 = vld [vmem:[%s1217_s3 + $0x18] sm:$0xff]  }
  0x94   :  { %488 = vmatpush1.bf16.msra.mxu1 %v856_v54 }
  0x95   :  { %489 = vmatprep.subr.bf16.mxu1 %v905_v4 }
  0x98   :  { %490 = vmatpush1.bf16.msra.mxu1 %v857_v55 }
  0x99   :  { %491 = vmatprep.subr.bf16.mxu1 %v905_v4 }
  0x9c   :  { %492 = vmatpush1.bf16.msra.mxu1 %v858_v56 }
  0x9d   :  { %493 = vmatprep.subr.bf16.mxu1 %v905_v4 }
  0xa0   :  { %494 = vmatpush1.bf16.msra.mxu1 %v859_v57 }
  0xa1   :  { %495 = vmatprep.subr.bf16.mxu1 %v905_v4 }
  0xff   :  { %v836_v58 = vpop.permute.xlu1 %835  ;;  %v831_v59 = vpop.permute.xlu0 %830 }
 0x100   :  { %v838_v60 = vunpack.i.h.bf16 %v836_v58  ;;  %v837_v61 = vunpack.i.l.bf16 %v836_v58  ;;  %v833_v62 = vunpack.i.h.bf16 %v831_v59  ;;  %v832_v63 = vunpack.i.l.bf16 %v831_v59  ;;  %v860_v58 = vld [vmem:[%s1217_s3 + $0x10] sm:$0xff]   ;;  %v861_v59 = vld [vmem:[%s1217_s3 + $0x8] sm:$0xff]  }
 0x101   :  { %496 = vmatpush1.bf16.msra.mxu1 %v860_v58 }
 0x102   :  { %v159_v5 = vsel %vm155_vm9, %v154_v1, %v838_v60  ;;  %v158_v6 = vsel %vm155_vm9, %v153_v0, %v837_v61  ;;  %v156_v7 = vsel %vm155_vm9, %v151_v2, %v832_v63  ;;  %v157_v8 = vsel %vm155_vm9, %v152_v3, %v833_v62  ;;  %497 = vmatprep.subr.bf16.mxu1 %v905_v4  ;;  %v862_v60 = vld [vmem:[%s1217_s3] sm:$0xff]   ;;  %v863_v61 = vld [vmem:[%s1217_s3 + $0x58] sm:$0xff]   ;;  %v864_v62 = vld [vmem:[%s1217_s3 + $0x50] sm:$0xff]  }
 0x103   :  { %v161_v10 = vpack.c.bf16 %v159_v5, %v158_v6  ;;  %v160_v11 = vpack.c.bf16 %v157_v8, %v156_v7  ;;  %v865_v63 = vld [vmem:[%s1217_s3 + $0x48] sm:$0xff]  }
 0x105   :  { %792 = vmatprep.mubr.msk.bf16.mxu0 %vm202_vm10, %v160_v11  ;;  %498 = vmatpush1.bf16.msra.mxu1 %v861_v59 }
 0x106   :  { %793 = vmatmul.mubr.msk.bf16.vlgmr.msra.gmra.mxu0 %vm202_vm10, %v161_v10  ;;  %499 = vmatprep.subr.bf16.mxu1 %v905_v4 }
 0x109   :  { %500 = vmatpush1.bf16.msra.mxu1 %v862_v60 }
 0x10a   :  { %509 = vmatprep.subr.bf16.mxu1 %v905_v4 }
 0x10d   :  { %510 = vmatpush2.bf16.msra.mxu1 %v863_v61 }
 0x10e   :  { %511 = vmatprep.subr.bf16.mxu1 %v905_v4 }
 0x111   :  { %512 = vmatpush2.bf16.msra.mxu1 %v864_v62 }
 0x112   :  { %513 = vmatprep.subr.bf16.mxu1 %v905_v4 }
 0x115   :  { %514 = vmatpush2.bf16.msra.mxu1 %v865_v63 }
 0x116   :  { %515 = vmatprep.subr.bf16.mxu1 %v905_v4  ;;  %v746_v4 = vld [vmem:[%s1218_s4 + $0x1] ss:$0 sm:$0xff] }
 0x1c6   :  { %v794_v12 = vpop.f32.mrf.mxu0 }
 0x1c7   :  { %v252_v15 = vadd.f32 %v794_v12, %v737_v13 }
 0x1c8   :  { %v243_v14 = vpop.f32.mrf.mxu0 }
 0x1c9   :  { %v244_v16 = vadd.f32 %v737_v13, %v243_v14  ;;  %v260_v20 = vmax.f32 %v252_v15, 0.0 }
 0x1ca   :  { %v795_v17 = vpop.f32.mrf.mxu0 }
 0x1cb   :  { %v258_v18 = vmax.f32 %v244_v16, 0.0  ;;  %v255_v21 = vadd.f32 %v795_v17, %v737_v13  ;;  %v268_v27 = vsel %vm155_vm9, %v260_v20, 0.0  ;;  %v866_v16 = vld [vmem:[%s1217_s3 + $0x40] sm:$0xff]  }
 0x1cc   :  { %v246_v19 = vpop.f32.mrf.mxu0  ;;  %516 = vmatpush2.bf16.msra.mxu1 %v866_v16 }
 0x1cd   :  { %v247_v22 = vadd.f32 %v737_v13, %v246_v19  ;;  %v262_v23 = vsel %vm155_vm9, %v258_v18, 0.0  ;;  %v261_v25 = vmax.f32 %v255_v21, 0.0  ;;  %v747_v19 = vld [vmem:[%s1218_s4 + $0x2] ss:$0 sm:$0xff] }
 0x1ce   :  { %263 = vadd.xlane.f32.xlu0 %v262_v23 }
 0x1cf   :  { %v259_v24 = vmax.f32 %v247_v22, 0.0  ;;  %v271_v28 = vsel %vm155_vm9, %v261_v25, 0.0 }
 0x1d1   :  { %v265_v26 = vsel %vm155_vm9, %v259_v24, 0.0 }
 0x1d2   :  { %266 = vadd.xlane.f32.xlu1 %v265_v26  ;;  %269 = vadd.xlane.f32.xlu0 %v268_v27 }
 0x1d6   :  { %272 = vadd.xlane.f32.xlu0 %v271_v28 }
 0x257   :  { %v264_v29 = vpop.xlane.xlu0 %263 }
 0x258   :  { %v275_v30 = vmul.f32 0.015625, %v264_v29 }
 0x25a   :  { %v1061_v31 = vsub.f32 %v258_v18, %v275_v30 }
 0x25b   :  { %v267_v32 = vpop.xlane.xlu1 %266  ;;  %v270_v33 = vpop.xlane.xlu0 %269 }
 0x25c   :  { %v276_v34 = vmul.f32 0.015625, %v267_v32  ;;  %v277_v35 = vmul.f32 0.015625, %v270_v33  ;;  %v283_v36 = vmul.f32 %v1061_v31, %v1061_v31 }
 0x25e   :  { %v1065_v37 = vsub.f32 %v259_v24, %v276_v34  ;;  %v1067_v40 = vsub.f32 %v260_v20, %v277_v35  ;;  %v287_v41 = vsel %vm155_vm9, %v283_v36, 0.0 }
 0x25f   :  { %288 = vadd.xlane.f32.xlu1 %v287_v41  ;;  %v273_v42 = vpop.xlane.xlu0 %272 }
 0x260   :  { %v278_v43 = vmul.f32 0.015625, %v273_v42  ;;  %v284_v44 = vmul.f32 %v1065_v37, %v1065_v37  ;;  %v285_v45 = vmul.f32 %v1067_v40, %v1067_v40 }
 0x262   :  { %v1074_v48 = vsub.f32 %v261_v25, %v278_v43  ;;  %v290_v49 = vsel %vm155_vm9, %v284_v44, 0.0  ;;  %v293_v50 = vsel %vm155_vm9, %v285_v45, 0.0 }
 0x263   :  { %291 = vadd.xlane.f32.xlu0 %v290_v49  ;;  %294 = vadd.xlane.f32.xlu1 %v293_v50 }
 0x264   :  { %v286_v51 = vmul.f32 %v1074_v48, %v1074_v48 }
 0x266   :  { %v296_v52 = vsel %vm155_vm9, %v286_v51, 0.0 }
 0x267   :  { %297 = vadd.xlane.f32.xlu0 %v296_v52 }
 0x2e8   :  { %v289_v0 = vpop.xlane.xlu1 %288 }
 0x2e9   :  { %v299_v1 = vmul.f32 0.015625, %v289_v0 }
 0x2eb   :  { %v303_v2 = vadd.f32 1e-05, %v299_v1 }
 0x2ec   :  { %v295_v3 = vpop.xlane.xlu1 %294  ;;  %v292_v5 = vpop.xlane.xlu0 %291 }
 0x2ed   :  { %867 = vrsqrt.f32 %v303_v2  ;;  %v301_v6 = vmul.f32 0.015625, %v295_v3  ;;  %v300_v7 = vmul.f32 0.015625, %v292_v5 }
 0x2ef   :  { %v305_v8 = vadd.f32 1e-05, %v301_v6  ;;  %v304_v10 = vadd.f32 1e-05, %v300_v7 }
 0x2f0   :  { %v298_v11 = vpop.xlane.xlu0 %297 }
 0x2f1   :  { %869 = vrsqrt.f32 %v305_v8  ;;  %v302_v12 = vmul.f32 0.015625, %v298_v11 }
 0x2f2   :  { %871 = vrsqrt.f32 %v304_v10 }
 0x2f3   :  { %v306_v13 = vadd.f32 1e-05, %v302_v12  ;;  %v748_v12 = vld [vmem:[%s1218_s4 + $0x3] ss:$0 sm:$0xff] }
 0x2f5   :  { %873 = vrsqrt.f32 %v306_v13 }
 0x2fa   :  { %v868_v14 = vpop.eup %867 }
 0x2fb   :  { %v311_v15 = vmul.f32 %v868_v14, %v1061_v31 }
 0x2fd   :  { %v319_v17 = vmul.f32 %v746_v4, %v311_v15 }
 0x2fe   :  { %v870_v18 = vpop.eup %869 }
 0x2ff   :  { %v872_v20 = vpop.eup %871  ;;  %v313_v21 = vmul.f32 %v870_v18, %v1067_v40  ;;  %v327_v23 = vadd.f32 %v747_v19, %v319_v17 }
 0x300   :  { %v312_v22 = vmul.f32 %v872_v20, %v1065_v37 }
 0x301   :  { %v321_v24 = vmul.f32 %v746_v4, %v313_v21  ;;  %v367_v30 = vrot.slane %v327_v23, 1  ;;  %v355_v36 = vrot.slane %v327_v23, 7 }
 0x302   :  { %v874_v25 = vpop.eup %873  ;;  %v320_v26 = vmul.f32 %v746_v4, %v312_v22 }
 0x303   :  { %v329_v27 = vadd.f32 %v747_v19, %v321_v24  ;;  %v314_v28 = vmul.f32 %v874_v25, %v1074_v48 }
 0x304   :  { %v328_v29 = vadd.f32 %v747_v19, %v320_v26 }
 0x305   :  { %v369_v31 = vrot.slane %v329_v27, 1  ;;  %v322_v32 = vmul.f32 %v746_v4, %v314_v28  ;;  %v357_v33 = vrot.slane %v329_v27, 7 }
 0x306   :  { %v839_v34 = vpack.i.bf16 %v328_v29, %v327_v23  ;;  %v368_v35 = vrot.slane %v328_v29, 1  ;;  %v356_v41 = vrot.slane %v328_v29, 7 }
 0x307   :  { %v330_v42 = vadd.f32 %v747_v19, %v322_v32 }
 0x308   :  { %840 = vrot.lane.b32.xlu1 %v839_v34, %s908_s2  ;;  %v372_v37 = vsel %vm91_vm0, %v368_v35, %v369_v31  ;;  %v373_v40 = vsel %vm91_vm0, %v367_v30, %v368_v35  ;;  %v361_v43 = vsel %vm60_vm3, %v355_v36, %v356_v41  ;;  %v360_v44 = vsel %vm60_vm3, %v356_v41, %v357_v33 }
 0x309   :  { %v375_v45 = vsel %vm112_vm4, %v373_v40, 0.0  ;;  %v376_v48 = vsel %vm113_vm5, %v372_v37, 0.0  ;;  %v844_v49 = vpack.i.bf16 %v330_v42, %v329_v27  ;;  %v370_v50 = vrot.slane %v330_v42, 1 }
 0x30a   :  { %v400_v51 = vpack.c.bf16 %v376_v48, %v375_v45  ;;  %v358_v52 = vrot.slane %v330_v42, 7  ;;  %v364_v0 = vsel %vm82_vm7, %v361_v43, 0.0  ;;  %v365_v6 = vsel %vm81_vm6, %v360_v44, 0.0 }
 0x30b   :  { %845 = vrot.lane.b32.xlu0 %v844_v49, %s908_s2  ;;  %v371_v53 = vsel %vm91_vm0, %v369_v31, %v370_v50  ;;  %v374_v54 = vsel %vm91_vm0, %v370_v50, %v367_v30 }
 0x30c   :  { %761 = vmatprep.mubr.msk.bf16.mxu1 %vm155_vm9, %v400_v51  ;;  %v362_v55 = vsel %vm60_vm3, %v358_v52, %v355_v36  ;;  %v377_v56 = vsel %vm112_vm4, %v371_v53, 0.0  ;;  %v378_v57 = vsel %vm113_vm5, %v374_v54, 0.0  ;;  %v359_v58 = vsel %vm60_vm3, %v357_v33, %v358_v52  ;;  %v609_v54 = vld [vmem:[#allocation2] sm:$0x1] }
 0x30d   :  { %v402_v59 = vpack.c.bf16 %v378_v57, %v377_v56  ;;  %v363_v63 = vsel %vm81_vm6, %v362_v55, 0.0  ;;  %v366_v7 = vsel %vm82_vm7, %v359_v58, 0.0  ;;  %v909_v55 = vmov 0.0  }
 0x30e   :  { %796 = vmatprep.subr.bf16.mxu0 %v909_v55  ;;  %798 = vmatprep.mubr.msk.bf16.mxu0 %vm910_vm11, %v909_v55 }
 0x37a   :  { %v841_v60 = vpop.permute.xlu1 %840 }
 0x37b   :  { %v843_v61 = vunpack.i.h.bf16 %v841_v60  ;;  %v842_v62 = vunpack.i.l.bf16 %v841_v60 }
 0x37d   :  { %v846_v1 = vpop.permute.xlu0 %845  ;;  %v395_v38 = vsel %vm155_vm9, %v363_v63, %v842_v62  ;;  %v396_v2 = vsel %vm155_vm9, %v364_v0, %v843_v61 }
 0x37e   :  { %v848_v39 = vunpack.i.h.bf16 %v846_v1  ;;  %v847_v3 = vunpack.i.l.bf16 %v846_v1  ;;  %v399_v5 = vpack.c.bf16 %v396_v2, %v395_v38 }
 0x380   :  { %518 = vmatmul.mubr.bf16.vlgmr.msra.gmra.mxu1 %v399_v5  ;;  %v397_v8 = vsel %vm155_vm9, %v365_v6, %v847_v3  ;;  %v398_v10 = vsel %vm155_vm9, %v366_v7, %v848_v39  ;;  %v763_v5 = vld [vmem:[%s1218_s4 + $0x4] ss:$0 sm:$0xff] }
 0x381   :  { %762 = vmatprep.mubr.msk.bf16.mxu1 %vm155_vm9, %v402_v59  ;;  %v401_v11 = vpack.c.bf16 %v398_v10, %v397_v8  ;;  %v764_v10 = vld [vmem:[%s1218_s4 + $0x5] ss:$0 sm:$0xff] }
 0x388   :  { %526 = vmatmul.mubr.bf16.gmra.mxu1 %v401_v11 }
 0x440   :  { %v519_v13 = vpop.f32.mrf.mxu1 }
 0x441   :  { %v520_v14 = vadd.f32 %v748_v12, %v519_v13 }
 0x442   :  { %v521_v46 = vpop.f32.mrf.mxu1 }
 0x443   :  { %v534_v4 = vmax.f32 %v520_v14, 0.0 }
 0x444   :  { %v522_v15 = vpop.f32.mrf.mxu1 }
 0x445   :  { %v523_v47 = vadd.f32 %v748_v12, %v522_v15  ;;  %v538_v16 = vsel %vm155_vm9, %v534_v4, 0.0 }
 0x446   :  { %v524_v17 = vpop.f32.mrf.mxu1  ;;  %539 = vadd.xlane.f32.xlu1 %v538_v16 }
 0x447   :  { %v535_v18 = vmax.f32 %v523_v47, 0.0 }
 0x448   :  { %v527_v19 = vpop.f32.mrf.mxu1 }
 0x449   :  { %v528_v20 = vadd.f32 %v748_v12, %v527_v19  ;;  %v541_v21 = vsel %vm155_vm9, %v535_v18, 0.0 }
 0x44a   :  { %542 = vadd.xlane.f32.xlu0 %v541_v21  ;;  %v529_v22 = vpop.f32.mrf.mxu1  ;;  %v608_v21 = vld [vmem:[%s1219_s5] sm:$0x1] }
 0x44b   :  { %v536_v23 = vmax.f32 %v528_v20, 0.0 }
 0x44c   :  { %v530_v24 = vpop.f32.mrf.mxu1 }
 0x44d   :  { %v531_v25 = vadd.f32 %v748_v12, %v530_v24  ;;  %v544_v26 = vsel %vm155_vm9, %v536_v23, 0.0  ;;  %v617_v24 = vsub.s32 0, %v971_v9 }
 0x44e   :  { %v532_v27 = vpop.f32.mrf.mxu1  ;;  %545 = vadd.xlane.f32.xlu1 %v544_v26  ;;  %v665_v26 = vld [vmem:[%s1215_s1] sm:$0x1] }
 0x44f   :  { %v537_v28 = vmax.f32 %v531_v25, 0.0  ;;  %vm666_vm12 = vcmp.ne.s32.totalorder %v665_v26, 0 }
 0x451   :  { %v547_v29 = vsel %vm155_vm9, %v537_v28, 0.0 }
 0x452   :  { %548 = vadd.xlane.f32.xlu0 %v547_v29 }
 0x4cf   :  { %v540_v30 = vpop.xlane.xlu1 %539 }
 0x4d0   :  { %v550_v31 = vmul.f32 0.015625, %v540_v30 }
 0x4d2   :  { %v554_v32 = vsub.f32 %v534_v4, %v550_v31 }
 0x4d3   :  { %v543_v33 = vpop.xlane.xlu0 %542 }
 0x4d4   :  { %v551_v34 = vmul.f32 0.015625, %v543_v33  ;;  %v558_v35 = vmul.f32 %v554_v32, %v554_v32  ;;  %v767_v33 = vld [vmem:[%s1215_s1 + $0x1] sm:$0x1] }
 0x4d5   :  { %vm715_vm14 = vcmp.ne.s32.totalorder %v767_v33, 0 }
 0x4d6   :  { %v555_v36 = vsub.f32 %v535_v18, %v551_v34  ;;  %v562_v41 = vsel %vm155_vm9, %v558_v35, 0.0 }
 0x4d7   :  { %563 = vadd.xlane.f32.xlu1 %v562_v41  ;;  %v546_v42 = vpop.xlane.xlu1 %545 }
 0x4d8   :  { %v552_v37 = vmul.f32 0.015625, %v546_v42  ;;  %v559_v40 = vmul.f32 %v555_v36, %v555_v36 }
 0x4da   :  { %v556_v43 = vsub.f32 %v536_v23, %v552_v37  ;;  %v565_v44 = vsel %vm155_vm9, %v559_v40, 0.0 }
 0x4db   :  { %566 = vadd.xlane.f32.xlu0 %v565_v44  ;;  %v549_v45 = vpop.xlane.xlu0 %548 }
 0x4dc   :  { %v553_v48 = vmul.f32 0.015625, %v549_v45  ;;  %v560_v49 = vmul.f32 %v556_v43, %v556_v43 }
 0x4de   :  { %v557_v50 = vsub.f32 %v537_v28, %v553_v48  ;;  %v568_v51 = vsel %vm155_vm9, %v560_v49, 0.0 }
 0x4df   :  { %569 = vadd.xlane.f32.xlu1 %v568_v51 }
 0x4e0   :  { %v561_v52 = vmul.f32 %v557_v50, %v557_v50 }
 0x4e2   :  { %v571_v53 = vsel %vm155_vm9, %v561_v52, 0.0 }
 0x4e3   :  { %572 = vadd.xlane.f32.xlu0 %v571_v53 }
 0x4f0   :  { %612 = vperm.xlu1 %818, %v609_v54  }
 0x560   :  { %v564_v56 = vpop.xlane.xlu1 %563 }
 0x561   :  { %v574_v57 = vmul.f32 0.015625, %v564_v56 }
 0x563   :  { %v578_v58 = vadd.f32 1e-05, %v574_v57 }
 0x564   :  { %v567_v59 = vpop.xlane.xlu0 %566 }
 0x565   :  { %875 = vrsqrt.f32 %v578_v58  ;;  %v575_v60 = vmul.f32 0.015625, %v567_v59 }
 0x567   :  { %v579_v61 = vadd.f32 1e-05, %v575_v60 }
 0x568   :  { %v570_v62 = vpop.xlane.xlu1 %569 }
 0x569   :  { %877 = vrsqrt.f32 %v579_v61  ;;  %v576_v63 = vmul.f32 0.015625, %v570_v62 }
 0x56b   :  { %v580_v0 = vadd.f32 1e-05, %v576_v63 }
 0x56c   :  { %v573_v1 = vpop.xlane.xlu0 %572  ;;  %v613_v25 = vpop.permute.xlu1 %612 }
 0x56d   :  { %879 = vrsqrt.f32 %v580_v0  ;;  %v577_v38 = vmul.f32 0.015625, %v573_v1  ;;  %v618_v27 = vrot.slane %v613_v25, %v617_v24 }
 0x56f   :  { %v581_v2 = vadd.f32 1e-05, %v577_v38 }
 0x571   :  { %881 = vrsqrt.f32 %v581_v2 }
 0x572   :  { %v876_v39 = vpop.eup %875 }
 0x573   :  { %v586_v3 = vmul.f32 %v876_v39, %v554_v32 }
 0x575   :  { %v594_v8 = vmul.f32 %v763_v5, %v586_v3 }
 0x576   :  { %v878_v6 = vpop.eup %877 }
 0x577   :  { %v587_v7 = vmul.f32 %v878_v6, %v555_v36  ;;  %v602_v13 = vadd.f32 %v764_v10, %v594_v8 }
 0x579   :  { %v595_v11 = vmul.f32 %v763_v5, %v587_v7 }
 0x57a   :  { %v880_v12 = vpop.eup %879 }
 0x57b   :  { %v603_v14 = vadd.f32 %v764_v10, %v595_v11  ;;  %v588_v46 = vmul.f32 %v880_v12, %v556_v43 }
 0x57d   :  { %v606_v4 = vpack.c.bf16 %v603_v14, %v602_v13  ;;  %v596_v17 = vmul.f32 %v763_v5, %v588_v46 }
 0x57e   :  { %v882_v15 = vpop.eup %881 }
 0x57f   :  { %v623_v47 = vsel %vm155_vm9, %v606_v4, 0  ;;  %v589_v16 = vmul.f32 %v882_v15, %v557_v50  ;;  %v604_v19 = vadd.f32 %v764_v10, %v596_v17 }
 0x580   :  { %797 = vmatpush3.bf16.xpose.msra.mxu0 %v623_v47 }
 0x581   :  { %802 = vmatprep.subr.bf16.mxu0 %v909_v55  ;;  %v597_v18 = vmul.f32 %v763_v5, %v589_v16 }
 0x583   :  { %v605_v20 = vadd.f32 %v764_v10, %v597_v18 }
 0x585   :  { %v607_v22 = vpack.c.bf16 %v605_v20, %v604_v19 }
 0x587   :  { %799 = vmatmul.mubr.msk.bf16.vlgmr.msra.gmra.mxu0 %vm155_vm9, %v608_v21  ;;  %v671_v23 = vsel %vm155_vm9, %v607_v22, 0 }
 0x588   :  { %803 = vmatpush3.bf16.xpose.msra.mxu0 %v671_v23  ;;  %804 = vmatprep.mubr.msk.bf16.mxu0 %vm910_vm11, %v909_v55 }
 0x58f   :  { %805 = vmatmul.mubr.msk.bf16.vlgmr.msra.gmra.mxu0 %vm155_vm9, %v608_v21 }
 0x647   :  { %v659_v28 = vpop.f32.mrf.mxu0 }
 0x648   :  { %v660_v29 = vadd.f32 %v659_v28, %v618_v27 }
 0x649   :  { %v800_v30 = vpop.f32.mrf.mxu0 }
 0x64a   :  { %v667_v31 = vsel %vm666_vm12, 0.0, %v660_v29 }
 0x64b   :  { %669 = vst.msk [vmem:[#allocation3] sm:$0x1] %vm668_vm13, %v667_v31  ;;  %v662_v32 = vpop.f32.mrf.mxu0 }
 0x64d   :  { %v801_v34 = vpop.f32.mrf.mxu0 }
 0x64f   :  { %v707_v9 = vpop.f32.mrf.mxu0 }
 0x650   :  { %v708_v35 = vadd.f32 %v707_v9, %v618_v27 }
 0x651   :  { %v806_v36 = vpop.f32.mrf.mxu0 }
 0x652   :  { %v716_v41 = vsel %vm715_vm14, 0.0, %v708_v35 }
 0x653   :  { %718 = vst.msk [vmem:[#allocation3 + $0x1] sm:$0x1] %vm668_vm13, %v716_v41  ;;  %v710_v42 = vpop.f32.mrf.mxu0 }
 0x654   :  { %894 = shalt.err (!%p891_p4)
}
 0x655   :  { %s912_s13 = smov 16   ;;  %s913_s1 = smov 1   ;;  %v807_v37 = vpop.f32.mrf.mxu0 }
 0x656   :  { %730 = dma.vmem_to_hbm [thread:$0]  %s725_s11, 32, %s1221_s7, [#allocation4], %s912_s13, %s912_s13, %s913_s1  }
 0x657   :  { %903 = dma.done.wait [#allocation4], 32  }
 0x658   :  { %904 = vsyncadd [#allocation4], 4294967264 }
 0x659   :  { %734 = vsyncpa [#allocation4], 1 }

</bundles_post_ra>
